<compile_context>
chip_gen: v5e
topology: v5e:2x2
jax: 0.10.0
libtpu: 0.0.40
codegen_flags: <defaults>
</compile_context>

<pallas_src>
import jax
import jax.numpy as jnp
from jax import lax
from jax.experimental import pallas as pl
from jax.experimental.pallas import tpu as pltpu


def _round_up(x, m):
    return ((x + m - 1) // m) * m


# ----------------------------------------------------------------------------
# Pallas kernel: TB batch elements per grid step, one batched im2col matmul
# ----------------------------------------------------------------------------
def _make_dyn_conv1d_kernel(ks, dilation, l_out_pad, pad_rows):
    def kernel(w_ref, b_ref, x_ref, o_ref):
        # w_ref : (tb, out, k_pad)      aggregated per-sample weights (compute dtype)
        # b_ref : (tb, out, 1)          aggregated per-sample bias (f32)
        # x_ref : (tb, in,  l_in)       padded input (compute dtype)
        # o_ref : (tb, out, l_out_pad)  lane-dense output tile
        x = x_ref[...]
        tb = x.shape[0]
        # im2col for the whole tile: static shifted lane slices, row = k*in + c
        cols = [x[:, :, k * dilation:k * dilation + l_out_pad] for k in range(ks)]
        if pad_rows:
            cols.append(jnp.zeros((tb, pad_rows, l_out_pad), x.dtype))
        x_cols = jnp.concatenate(cols, axis=1) if len(cols) > 1 else cols[0]
        # single batched matmul: (tb, out, k_pad) @ (tb, k_pad, l_out_pad)
        acc = lax.dot_general(
            w_ref[...], x_cols,
            dimension_numbers=(((2,), (1,)), ((0,), (0,))),
            preferred_element_type=jnp.float32)
        acc = acc + b_ref[...]                     # f32 epilogue bias add
        o_ref[...] = acc.astype(o_ref.dtype)
    return kernel


# ----------------------------------------------------------------------------
# attention1d (AdaptiveAvgPool1d(1) -> 1x1 conv -> relu -> 1x1 conv -> softmax/T)
# ----------------------------------------------------------------------------
def attention1d_forward(reference, fc1_w, fc2_w, fc2_b, temperature):
    pooled = jnp.mean(reference, axis=-1)                   # (B, ref_planes)
    h = jnp.maximum(pooled @ fc1_w.T, 0.0)                  # 1x1 conv (no bias) + relu
    logits = h @ fc2_w.T + fc2_b                            # 1x1 conv (bias)
    return jax.nn.softmax(logits / temperature, axis=-1)    # (B, K)


# ----------------------------------------------------------------------------
# Wrapper
# ----------------------------------------------------------------------------
def dynamic_conv1d_refer(reference, x, params, *, stride=1, padding=0,
                         dilation=1, groups=1, temperature=34,
                         compute_dtype=jnp.bfloat16, out_dtype=None,
                         batch_tile=None,
                         vmem_tile_budget_bytes=20 * 1024 * 1024):
    # TODO(synk): grouped dynamic conv (groups > 1) and strided conv
    # (stride > 1) are not implemented in the Pallas kernel.
    assert groups == 1
    assert stride == 1

    B, in_planes, L = x.shape
    weight = params["weight"]                    # (K, out, in, ks)
    bias = params.get("bias", None)              # (K, out) or None
    K, out_planes, _, ks = weight.shape
    out_dtype = x.dtype if out_dtype is None else out_dtype

    # --- attention + hoisted expert aggregation (one batched matmul, f32) ----
    att = attention1d_forward(reference, params["fc1_w"], params["fc2_w"],
                              params["fc2_b"], temperature)          # (B, K)
    # transpose the small expert-weight tensor ONCE so att @ w_t yields the
    # kernel's (out, ks*in) im2col layout directly.
    w_t = jnp.transpose(weight, (0, 1, 3, 2)).reshape(
        K, out_planes * ks * in_planes)
    agg_w = (att @ w_t).reshape(B, out_planes, ks * in_planes)        # f32
    if bias is not None:
        agg_b = att @ bias                                            # (B, out) f32
    else:
        agg_b = jnp.zeros((B, out_planes), jnp.float32)

    # --- geometry -------------------------------------------------------------
    l_out = (L + 2 * padding - dilation * (ks - 1) - 1) // stride + 1
    assert l_out > 0, (f"invalid conv geometry: L={L}, padding={padding}, "
                       f"dilation={dilation}, kernel_size={ks}")
    l_out_pad = _round_up(l_out, 128)              # lane-dense output stores
    l_in = l_out_pad + dilation * (ks - 1)         # exact halo, no 128 round-up

    csz = jnp.dtype(compute_dtype).itemsize
    osz = jnp.dtype(out_dtype).itemsize
    k_real = ks * in_planes
    k_pad = _round_up(k_real, 16 if csz == 2 else 8)   # sublane-friendly depth
    pad_rows = k_pad - k_real

    # --- batch tile: fit double-buffered tiles in VMEM & keep >=2 grid steps --
    per_elem = (2 * (in_planes * l_in * csz                  # x   (dbl-buffered)
                     + out_planes * k_pad * csz              # w
                     + out_planes * 4                        # bias
                     + out_planes * l_out_pad * osz)         # out (dbl-buffered)
                + k_pad * l_out_pad * csz                    # im2col scratch
                + out_planes * l_out_pad * 4)                # f32 accumulator
    tb = max(1, vmem_tile_budget_bytes // max(per_elem, 1))
    if B >= 2:
        tb = min(tb, -(-B // 2))      # at least 2 grid steps (v7x megacore)
    tb = min(tb, B)
    if batch_tile is not None:        # explicit override
        tb = max(1, min(batch_tile, B))
    b_pad = _round_up(B, tb)
    # TODO(synk): add an L grid axis (tile l_out) for very large sequences
    # where a single batch element exceeds the VMEM tile budget.

    # --- pad operands ----------------------------------------------------------
    x_p = jnp.pad(x.astype(compute_dtype),
                  ((0, b_pad - B), (0, 0),
                   (padding, l_in - L - padding)))
    w_p = jnp.pad(agg_w, ((0, b_pad - B), (0, 0),
                          (0, pad_rows))).astype(compute_dtype)
    b_p = jnp.pad(agg_b, ((0, b_pad - B), (0, 0))).astype(jnp.float32)
    b_p = b_p[:, :, None]                                     # (b_pad, out, 1)

    kernel = _make_dyn_conv1d_kernel(ks, dilation, l_out_pad, pad_rows)

    flops = 2 * b_pad * out_planes * k_pad * l_out_pad
    bytes_accessed = (int(x_p.size) * csz + int(w_p.size) * csz
                      + int(b_p.size) * 4
                      + b_pad * out_planes * l_out_pad * osz)

    out = pl.pallas_call(
        kernel,
        out_shape=jax.ShapeDtypeStruct((b_pad, out_planes, l_out_pad), out_dtype),
        grid_spec=pltpu.PrefetchScalarGridSpec(
            num_scalar_prefetch=0,
            grid=(b_pad // tb,),
            in_specs=[
                pl.BlockSpec((tb, out_planes, k_pad), lambda i: (i, 0, 0)),
                pl.BlockSpec((tb, out_planes, 1), lambda i: (i, 0, 0)),
                pl.BlockSpec((tb, in_planes, l_in), lambda i: (i, 0, 0)),
            ],
            out_specs=pl.BlockSpec((tb, out_planes, l_out_pad),
                                   lambda i: (i, 0, 0)),
        ),
        compiler_params=pltpu.CompilerParams(
            dimension_semantics=("parallel",),
            vmem_limit_bytes=32 * 1024 * 1024),
        cost_estimate=pl.CostEstimate(flops=flops, transcendentals=0,
                                      bytes_accessed=bytes_accessed),
    )(w_p, b_p, x_p)

    return out[:B, :, :l_out]


# ----------------------------------------------------------------------------
# Pure-JAX f32 reference (mirrors the PyTorch forward) for correctness check
# ----------------------------------------------------------------------------
def reference_forward(reference, x, params, *, padding=0, dilation=1,
                      temperature=34):
    B, in_planes, L = x.shape
    weight = params["weight"]
    bias = params["bias"]
    K, out_planes, _, ks = weight.shape

    att = attention1d_forward(reference, params["fc1_w"], params["fc2_w"],
                              params["fc2_b"], temperature)          # (B, K)
    agg_w = (att @ weight.reshape(K, -1)).reshape(B, out_planes, in_planes, ks)
    agg_b = att @ bias                                                # (B, out)

    x_pad = jnp.pad(x, ((0, 0), (0, 0), (padding, padding)))
    l_out = L + 2 * padding - dilation * (ks - 1)

    out = jnp.zeros((B, out_planes, l_out), jnp.float32)
    for k in range(ks):
        out = out + jnp.einsum("boc,bcl->bol", agg_w[:, :, :, k],
                               x_pad[:, :, k * dilation:k * dilation + l_out])
    return out + agg_b[:, :, None]


# ----------------------------------------------------------------------------
# Demo
# ----------------------------------------------------------------------------
if __name__ == "__main__":
    # module hyper-params (small shapes consistent with the module)
    B = 2
    reference_planes = 6
    in_planes = 4
    out_planes = 8
    kernel_size = 3
    padding = 1
    K = 4
    ratio = 0.25
    temperature = 34
    L = 16
    L_ref = 16
    hidden_planes = int(reference_planes * ratio) + 1   # attention1d hidden dim

    key = jax.random.PRNGKey(0)
    k0, k1, k2, k3, k4, k5, k6 = jax.random.split(key, 7)

    params = {
        # (K, out_planes, in_planes // groups, kernel_size)
        "weight": jax.random.normal(
            k0, (K, out_planes, in_planes, kernel_size), jnp.float32) * 0.3,
        # bias is learnable (init zeros in the module); use small random values
        # so the bias path is actually exercised.
        "bias": jax.random.normal(k6, (K, out_planes), jnp.float32) * 0.1,
        # attention1d: fc1 (Conv1d 1x1, no bias), fc2 (Conv1d 1x1, bias)
        "fc1_w": jax.random.normal(k1, (hidden_planes, reference_planes),
                                   jnp.float32) * 0.3,
        "fc2_w": jax.random.normal(k2, (K, hidden_planes), jnp.float32) * 0.3,
        "fc2_b": jax.random.normal(k3, (K,), jnp.float32) * 0.1,
    }

    reference = jax.random.normal(k4, (B, reference_planes, L_ref), jnp.float32)
    x = jax.random.normal(k5, (B, in_planes, L), jnp.float32)

    out = dynamic_conv1d_refer(reference, x, params, stride=1, padding=padding,
                               dilation=1, groups=1, temperature=temperature)
    out = jax.block_until_ready(out)

    ref_out = reference_forward(reference, x, params, padding=padding,
                                dilation=1, temperature=temperature)

    assert out.shape == (B, out_planes, L)      # stride=1, pad=1, ks=3 -> same L
    # tolerance accounts for bf16 MXU operands (f32 accumulation, f32 bias add)
    assert jnp.allclose(out, ref_out, rtol=5e-2, atol=5e-2), (
        float(jnp.max(jnp.abs(out - ref_out))))
    print("KERNEL_OK")
</pallas_src>

<mosaic_0001>
module attributes {stable_mosaic.version = 11 : i64} {
  func.func @kernel(%arg0: i32, %arg1: memref<1x8x16xbf16, #tpu.memory_space<vmem>>, %arg2: memref<1x8x1xf32, #tpu.memory_space<vmem>>, %arg3: memref<1x4x130xbf16, #tpu.memory_space<vmem>>, %arg4: memref<1x8x128xf32, #tpu.memory_space<vmem>>) attributes {dimension_semantics = [#tpu.dimension_semantics<parallel>], iteration_bounds = array<i64: 2>, scalar_prefetch = 0 : i64, scratch_operands = 0 : i64, tpu.core_type = #tpu.core_type<tc>, window_params = [{transform_indices = @transform_0, window_bounds = array<i64: 1, 8, 16>}, {transform_indices = @transform_1, window_bounds = array<i64: 1, 8, 1>}, {transform_indices = @transform_2, window_bounds = array<i64: 1, 4, 130>}, {transform_indices = @transform_3, window_bounds = array<i64: 1, 8, 128>}]} {
    %c0 = arith.constant 0 : index
    %c0_0 = arith.constant 0 : index
    %c0_1 = arith.constant 0 : index
    %0 = vector.load %arg3[%c0, %c0_0, %c0_1] : memref<1x4x130xbf16, #tpu.memory_space<vmem>>, vector<1x4x130xbf16>
    %1 = vector.extract_strided_slice %0 {offsets = [0, 0, 0], sizes = [1, 4, 128], strides = [1, 1, 1]} : vector<1x4x130xbf16> to vector<1x4x128xbf16>
    %2 = vector.extract_strided_slice %0 {offsets = [0, 0, 1], sizes = [1, 4, 128], strides = [1, 1, 1]} : vector<1x4x130xbf16> to vector<1x4x128xbf16>
    %3 = vector.extract_strided_slice %0 {offsets = [0, 0, 2], sizes = [1, 4, 128], strides = [1, 1, 1]} : vector<1x4x130xbf16> to vector<1x4x128xbf16>
    %cst = arith.constant 0.000000e+00 : bf16
    %4 = vector.broadcast %cst : bf16 to vector<1x4x128xbf16>
    %5 = tpu.concatenate %1, %2, %3, %4 in 1 : vector<1x4x128xbf16>, vector<1x4x128xbf16>, vector<1x4x128xbf16>, vector<1x4x128xbf16> -> vector<1x16x128xbf16>
    %c0_2 = arith.constant 0 : index
    %c0_3 = arith.constant 0 : index
    %c0_4 = arith.constant 0 : index
    %6 = vector.load %arg1[%c0_2, %c0_3, %c0_4] : memref<1x8x16xbf16, #tpu.memory_space<vmem>>, vector<1x8x16xbf16>
    %cst_5 = arith.constant dense<0.000000e+00> : vector<1x8x128xf32>
    %7 = tpu.matmul %6, %5, %cst_5 {dimension_numbers = #tpu.dot_dimension_numbers<[2], [1], [1], [2], [0, 0, 0, 1, 1, 2], [0], [0]>} : vector<1x8x16xbf16>, vector<1x16x128xbf16>, vector<1x8x128xf32> -> vector<1x8x128xf32>
    %c0_6 = arith.constant 0 : index
    %c0_7 = arith.constant 0 : index
    %c0_8 = arith.constant 0 : index
    %8 = vector.load %arg2[%c0_6, %c0_7, %c0_8] : memref<1x8x1xf32, #tpu.memory_space<vmem>>, vector<1x8x1xf32>
    %9 = vector.broadcast %8 : vector<1x8x1xf32> to vector<1x8x128xf32>
    %10 = arith.addf %7, %9 : vector<1x8x128xf32>
    %c0_9 = arith.constant 0 : index
    %c0_10 = arith.constant 0 : index
    %c0_11 = arith.constant 0 : index
    %11 = vector.load %arg4[%c0_9, %c0_10, %c0_11] : memref<1x8x128xf32, #tpu.memory_space<vmem>>, vector<1x8x128xf32>
    tpu.vector_store %arg4[%c0_9, %c0_10, %c0_11], %10 {strides = array<i32>} : memref<1x8x128xf32, #tpu.memory_space<vmem>>, vector<1x8x128xf32>,
    return
  }
  func.func @transform_0(%arg0: i32) -> (i32, i32, i32) {
    %c0_i32 = arith.constant 0 : i32
    %c0_i32_0 = arith.constant 0 : i32
    %c0_i32_1 = arith.constant 0 : i32
    return %arg0, %c0_i32, %c0_i32_0 : i32, i32, i32
  }
  func.func @transform_1(%arg0: i32) -> (i32, i32, i32) {
    %c0_i32 = arith.constant 0 : i32
    %c0_i32_0 = arith.constant 0 : i32
    %c0_i32_1 = arith.constant 0 : i32
    return %arg0, %c0_i32, %c0_i32_0 : i32, i32, i32
  }
  func.func @transform_2(%arg0: i32) -> (i32, i32, i32) {
    %c0_i32 = arith.constant 0 : i32
    %c0_i32_0 = arith.constant 0 : i32
    %c0_i32_1 = arith.constant 0 : i32
    return %arg0, %c0_i32, %c0_i32_0 : i32, i32, i32
  }
  func.func @transform_3(%arg0: i32) -> (i32, i32, i32) {
    %c0_i32 = arith.constant 0 : i32
    %c0_i32_0 = arith.constant 0 : i32
    %c0_i32_1 = arith.constant 0 : i32
    return %arg0, %c0_i32, %c0_i32_0 : i32, i32, i32
  }
}

</mosaic_0001>

<bundles_post_ra>
// kernel: tpu_custom_call.1
= control target key start
LH: loop header
LB: loop body
LE: loop exit
PB: predicated region body
PF: predicated region fallthrough
CT: control target
= control target key end

     0   :  { %8 = vsyncpa [#allocation3], 0  ;;  %s609_s0 = inlined_call_operand.vmem [shape: bf16[2,8,16], index: 0, kind: input, shape index: {}]   ;;  %s610_s1 = inlined_call_operand.vmem [shape: f32[2,8,1], index: 1, kind: input, shape index: {}]   ;;  %s611_s2 = inlined_call_operand.vmem [shape: bf16[2,4,130], index: 2, kind: input, shape index: {}]   ;;  %s612_s3 = inlined_call_operand.hbm [shape: f32[2,8,128], index: 3, kind: output, shape index: {}]  }
   0x1   :  { %10 = vsyncpa [#allocation3 + $0x1], 0  ;;  %s510_s12 = smov 0   ;;  %s512_s13 = smov 0  }
   0x2   :  { %s514_s14 = smov 0   ;;  %s516_s15 = smov 0  }
   0x3 LB: > { %s531_s16 = sadd.s32 4294967295, %s485_s15   ;;  %s364_s17 = sadd.s32 4294967294, %s485_s15   ;;  %s485_s15 = sphi %s516_s15, %s618_s15   ;;  %s481_s14 = sphi %s514_s14, %s617_s14   ;;  %s477_s13 = sphi %s512_s13, %s616_s13   ;;  %s473_s12 = sphi %s510_s12, %s615_s12  }
   0x4   : > { %s535_s18 = sadd.s32 1, %s485_s15   ;;  %s101_s19 = sadd.s32 1, %s481_s14 }
   0x5   : > { %s98_s20 = ssub.s32 %s485_s15, %s535_s18  ;;  %p111_p0 = scmp.ne.s32.totalorder %s481_s14, %s477_s13 }
   0x6   : > { %p99_p1 = scmp.eq.s32.totalorder %s98_s20, 0  ;;  %p112_p2 = scmp.eq.s32.totalorder %s531_s16, 1 }
   0x7   : > { %p117_p3 = scmp.ne.s32.totalorder %s477_s13, %s473_s12  ;;  %p118_p4 = scmp.eq.s32.totalorder %s364_s17, 1 }
   0x8   : > { %s546_s21 = scalar_select %p99_p1, %s481_s14, %s101_s19  }
   0x9   : > { %p548_p5 = por %p112_p2, %p111_p0  ;;  %p552_p6 = por %p118_p4, %p117_p3 }
   0xa   : > { %p367_p7 = scmp.ge.s32.totalorder %s485_s15, 1  ;;  %p158_p8 = scmp.lt.s32.totalorder %s485_s15, 3 }
   0xc   : > { %p159_p9 = pnand %p367_p7, %p158_p8 }
   0xd   : > { %p190_p10 = scmp.lt.s32.totalorder (!%p159_p9), %s531_s16, 1  ;;  %s487_s29 = smov (!%p159_p9), 127  }
   0xe   : > { %162 = sbr.rel (%p159_p9) target bundleno = 303 (0x12f), region = 32  ;;  %s488_s30 = smov (!%p159_p9), 126  }
   0xf   : > { %s187_s11 = sand.u32 (!%p159_p9), 1, %s477_s13   ;;  %s375_s17 = sshll.u32 (!%p159_p9), %s531_s16, 3 }
  0x10   : > { %s368_s19 = sshll.u32 (!%p159_p9), %s187_s11, 3  ;;  %s276_s27 = scalar_lea.hbm (!%p159_p9), %s612_s3, %s375_s17 }
  0x11   : > { %s443_s6 = scalar_lea.hbm (!%p159_p9), %s612_s3, 16 }
  0x13   : > { %s560_s24 = scalar_select %p190_p10, %s531_s16, 1  ;;  %v489_v6 = vmov 0   ;;  %vm216_vm0 = vcmask 1039360   ;;  %vm228_vm1 = vcmask 1031168   ;;  %vm230_vm2 = vcmask 1041408  }
  0x14   : > { %421 = vset.pattern.permute.xlu2 %v489_v6  ;;  %422 = vset.pattern.permute.xlu0 %v489_v6  ;;  %vm233_vm3 = vcmask 1043456   ;;  %vm236_vm4 = vcmask 1045504   ;;  %vm247_vm5 = vcmask 130048  }
  0x15   : > { %s369_s25 = sshll.u32 %s560_s24, 2  ;;  %s370_s4 = sshll.u32 %s560_s24, 3 }
  0x16   : > { %s202_s28 = scalar_lea.vmem %s611_s2, %s369_s25  ;;  %s197_s7 = scalar_lea.vmem %s610_s1, %s370_s4 }
  0x17   : > { %v204_v0 = vld [vmem:[%s202_s28] sm:$0xf]  ;;  %s193_s10 = scalar_lea.vmem %s609_s0, %s369_s25  ;;  %s189_s24 = scalar_lea.vmem [#allocation2], %s368_s19 }
  0x18   : > { %207 = vst [vmem:[#allocation1 + $0x1] ss:$4 sm:$0xff] %v204_v0  ;;  %v241_v5 = vld [vmem:[%s197_s7] sm:$0xff]  ;;  %s278_s28 = sshll.u32 %s189_s24, 4  ;;  %s266_s25 = scalar_lea.sflag [#allocation3], %s187_s11  ;;  %s279_s28 = int_to_ptr.vmem [resolvable:$true] %s278_s28 }
  0x19   : > { %244 = vperm.xlu2 %421, %v241_v5   ;;  %v240_v16 = vld [vmem:[%s193_s10] sm:$0xf] }
  0x1f   : > { %v208_v1 = vld.sshfl [vmem:[#allocation1] sm:$0xff pattern:$0x73625140]  ;;  %v210_v2 = vld.sshfl [vmem:[#allocation1 + $0x8] sm:$0xff pattern:$0x73625140] }
  0x20   : > { %212 = vrot.lane.b32.xlu0 %v208_v1, %s487_s29  ;;  %219 = vst [vmem:[#allocation1 + $0x2] ss:$4 sm:$0xff] %v204_v0 }
  0x27   : > { %v220_v3 = vld.sshfl [vmem:[#allocation1] sm:$0xff pattern:$0x73625140]  ;;  %v222_v4 = vld.sshfl [vmem:[#allocation1 + $0x8] sm:$0xff pattern:$0x73625140] }
  0x28   : > { %214 = vrot.lane.b32.xlu0 %v210_v2, %s487_s29  ;;  %224 = vrot.lane.b32.xlu1 %v220_v3, %s488_s30  ;;  %s280_s29 = sshll.u32 %s276_s27, 4  ;;  %s281_s29 = int_to_ptr.hbm [resolvable:$true] %s280_s29 }
  0x30   : > { %226 = vrot.lane.b32.xlu1 %v222_v4, %s488_s30  ;;  %s437_s30 = sshra.s32 %s281_s29, 4  ;;  %s438_s30 = int_to_ptr.hbm [resolvable:$true] %s437_s30 }
  0x31   : > { %s439_s4 = scalar_lea.hbm %s438_s30, 8  ;;  %p444_p0 = scmp.lt.s32.totalorder %s438_s30, %s612_s3 }
  0x32   : > { %p440_p11 = scmp.ne.s32.totalorder %s438_s30, %s439_s4  ;;  %p445_p1 = scmp.lt.s32.totalorder %s443_s6, %s439_s4 }
  0x34   : > { %p441_p12 = pnand %p440_p11, %p548_p5  ;;  %p446_p2 = por %p445_p1, %p444_p0 }
  0x36   : > { %p442_p13 = pneg %p441_p12 }
  0x38   : > { %p447_p3 = pnand %p446_p2, %p442_p13 }
  0x73   : > { %v245_v17 = vpop.permute.xlu2 %244 }
  0x92   : > { %v213_v7 = vpop.permute.xlu0 %212 }
  0x9a   : > { %v225_v8 = vpop.permute.xlu1 %224  ;;  %v215_v9 = vpop.permute.xlu0 %214 }
  0x9b   : > { %v217_v10 = vsel %vm216_vm0, %v213_v7, %v215_v9 }
  0x9c   : > { %v232_v13 = vsel %vm230_vm2, %v204_v0, %v217_v10 }
  0xa2   : > { %v227_v11 = vpop.permute.xlu1 %226 }
  0xa3   : > { %v229_v12 = vsel %vm228_vm1, %v225_v8, %v227_v11 }
  0xa4   : > { %v235_v14 = vsel %vm233_vm3, %v232_v13, %v229_v12 }
  0xa5   : > { %v238_v15 = vsel %vm236_vm4, %v235_v14, 0 }
  0xa6   : > { %258 = vmatpush.bf16.msra.mxu0 %v238_v15 }
  0xa9   : > { %373 = vmatmul.msk.bf16.vlgmr.msra.gmra.mxu0 %vm247_vm5, %v240_v16 }
 0x126   : > { %v260_v18 = vpop.f32.mrf.mxu0 }
 0x127   : > { %v261_v19 = vadd.f32 %v260_v18, %v245_v17 }
 0x129   : > { %264 = vst [vmem:[%s189_s24] sm:$0xff] %v261_v19 }
 0x12a   : > { %450 = shalt.err (!%p447_p3)
}
 0x12b   : > { %379 = dma.vmem_to_hbm [thread:$0]  (%p548_p5), %s279_s28, 128, %s281_s29, %s266_s25  }
 0x12e   : > { %v262_v20 = vpop.f32.mrf.mxu0 }
 0x12f PF: > { %p385_p4 = scmp.ge.s32.totalorder %s485_s15, 2  ;;  %s292_s9 = sand.u32 1, %s473_s12  }
 0x130   : > { %s293_s10 = scalar_lea.sflag [#allocation3], %s292_s9 }
 0x131   : > { %p382_p7 = pnand %p385_p4, %p552_p6 }
 0x133   : > { %p383_p8 = pneg %p382_p7 }
 0x135   : > { %468 = dma.done.wait (%p383_p8), %s293_s10, 128  }
 0x136   : > { %470 = vsyncadd (%p383_p8), %s293_s10, 4294967168  ;;  %p13_p9 = scmp.ge.s32.totalorder %s535_s18, 4   ;;  %s615_s12 = smov %s477_s13 }
 0x137   : > { %s616_s13 = smov %s481_s14  ;;  %s617_s14 = smov %s546_s21 }
 0x138   : > { %s618_s15 = smov %s535_s18  ;;  %15 = sbr.rel (!%p13_p9) target bundleno = 3 (0x3), region = 75 }
 0x13d   :  { %299 = vsyncpa [#allocation3], 1 }
 0x13e   :  { %301 = vsyncpa [#allocation3 + $0x1], 1 }

</bundles_post_ra>
